<compile_context>
chip_gen: v7x
topology: tpu7x:2x2x1
jax: 0.10.0
libtpu: 0.0.40
codegen_flags: <defaults>
</compile_context>

<pallas_src>
import jax
import jax.numpy as jnp
from jax import lax
from jax.experimental import pallas as pl
from jax.experimental.pallas import tpu as pltpu


def _ct_loss_kernel(y1_ref, y2_ref, t1_ref, t2_ref, out_ref):
    # Upcast after the DMA so bf16 callers move half the HBM bytes.
    y1 = y1_ref[...].astype(jnp.float32)  # (TM, C)
    y2 = y2_ref[...].astype(jnp.float32)  # (TM, C)

    # One shared (TM, C) class-index iota (JAX does not CSE broadcasts).
    col = lax.broadcasted_iota(jnp.int32, y1.shape, 1)

    def ce_rows(y, tgt):
        # Per-row CE: -logp[i, t_i] = m_i + log(sum_j exp(y_ij - m_i)) - y[i, t_i]
        m = jnp.max(y, axis=-1, keepdims=True)                          # (TM, 1)
        lse = jnp.log(jnp.sum(jnp.exp(y - m), axis=-1, keepdims=True))  # (TM, 1)
        onehot = (col == tgt).astype(jnp.float32)                       # (TM, C)
        gathered = jnp.sum(onehot * y, axis=-1, keepdims=True)          # (TM, 1)
        return m + lse - gathered                                       # (TM, 1)

    out_ref[...] = ce_rows(y1, t1_ref[...]) + ce_rows(y2, t2_ref[...])


def _round_up(x, m):
    return ((x + m - 1) // m) * m


def _pick_block_rows(n, c, itemsize):
    # Target ~4 MiB per logit tile: with 2 inputs x 2 pipeline buffers that is
    # ~16 MiB of VMEM, under the scoped default on v5e/v6e/v7x.
    target_bytes = 4 * 1024 * 1024
    tm = target_bytes // max(1, c * itemsize)
    tm = max(8, min(1024, (tm // 8) * 8))
    tm = min(tm, _round_up(n, 8))
    return tm


def ct_loss(y1, y2, d, *, block_rows=None):
    """Pallas implementation of CTLoss.forward(y1, y2, d)."""
    assert y1.ndim == 2 and y2.ndim == 2 and y1.shape == y2.shape
    assert d.ndim == 2 and d.shape[1] == 2 and d.shape[0] == y1.shape[0]
    n, c = y1.shape

    # Split targets into two contiguous (N, 1) int32 columns in the wrapper so
    # the kernel never does a strided sublane slice of a lane-sparse buffer.
    t1 = d[:, 0:1].astype(jnp.int32)
    t2 = d[:, 1:2].astype(jnp.int32)

    itemsize = jnp.dtype(y1.dtype).itemsize
    tm = block_rows or _pick_block_rows(n, c, itemsize)
    grid = (pl.cdiv(n, tm),)

    per_row = pl.pallas_call(
        _ct_loss_kernel,
        out_shape=jax.ShapeDtypeStruct((n, 1), jnp.float32),
        grid=grid,
        in_specs=[
            pl.BlockSpec((tm, c), lambda i: (i, 0)),
            pl.BlockSpec((tm, c), lambda i: (i, 0)),
            pl.BlockSpec((tm, 1), lambda i: (i, 0)),
            pl.BlockSpec((tm, 1), lambda i: (i, 0)),
        ],
        out_specs=pl.BlockSpec((tm, 1), lambda i: (i, 0)),
        compiler_params=pltpu.CompilerParams(
            dimension_semantics=("parallel",),
        ),
    )(y1, y2, t1, t2)

    # Final tiny reduction (N elements) stays in XLA.
    return jnp.sum(per_row)


def _ct_loss_ref(y1, y2, d):
    """Pure-JAX reference (mirrors torch.nn.CrossEntropyLoss(reduction='sum'))."""
    def ce(y, t):
        logp = jax.nn.log_softmax(y.astype(jnp.float32), axis=-1)
        return -jnp.sum(jnp.take_along_axis(logp, t[:, None], axis=-1))
    return ce(y1, d[:, 0]) + ce(y2, d[:, 1])


if __name__ == "__main__":
    key = jax.random.PRNGKey(0)
    k1, k2, k3 = jax.random.split(key, 3)

    N, C = 8, 32  # batch=8, num_classes=32
    y1 = jax.random.normal(k1, (N, C), dtype=jnp.float32)
    y2 = jax.random.normal(k2, (N, C), dtype=jnp.float32)
    d = jax.random.randint(k3, (N, 2), minval=0, maxval=C, dtype=jnp.int32)

    loss = ct_loss(y1, y2, d)
    jax.block_until_ready(loss)

    ref = _ct_loss_ref(y1, y2, d)
    assert jnp.allclose(loss, ref, rtol=1e-5, atol=1e-5), (loss, ref)

    print("KERNEL_OK")
</pallas_src>

<mosaic_0001>
module attributes {stable_mosaic.version = 11 : i64} {
  func.func @_ct_loss_kernel(%arg0: i32, %arg1: memref<8x32xf32, #tpu.memory_space<vmem>>, %arg2: memref<8x32xf32, #tpu.memory_space<vmem>>, %arg3: memref<8x1xi32, #tpu.memory_space<vmem>>, %arg4: memref<8x1xi32, #tpu.memory_space<vmem>>, %arg5: memref<8x1xf32, #tpu.memory_space<vmem>>) attributes {dimension_semantics = [#tpu.dimension_semantics<parallel>], iteration_bounds = array<i64: 1>, scalar_prefetch = 0 : i64, scratch_operands = 0 : i64, tpu.core_type = #tpu.core_type<tc>, window_params = [{transform_indices = @transform_0, window_bounds = array<i64: 8, 32>}, {transform_indices = @transform_1, window_bounds = array<i64: 8, 32>}, {transform_indices = @transform_2, window_bounds = array<i64: 8, 1>}, {transform_indices = @transform_3, window_bounds = array<i64: 8, 1>}, {transform_indices = @transform_4, window_bounds = array<i64: 8, 1>}]} {
    %c0 = arith.constant 0 : index
    %c0_0 = arith.constant 0 : index
    %0 = vector.load %arg1[%c0, %c0_0] : memref<8x32xf32, #tpu.memory_space<vmem>>, vector<8x32xf32>
    %c0_1 = arith.constant 0 : index
    %c0_2 = arith.constant 0 : index
    %1 = vector.load %arg2[%c0_1, %c0_2] : memref<8x32xf32, #tpu.memory_space<vmem>>, vector<8x32xf32>
    %2 = tpu.iota {dimensions = array<i32: 1>} : vector<8x32xi32>
    %c0_3 = arith.constant 0 : index
    %c0_4 = arith.constant 0 : index
    %3 = vector.load %arg3[%c0_3, %c0_4] : memref<8x1xi32, #tpu.memory_space<vmem>>, vector<8x1xi32>
    %cst = arith.constant dense<0xFF800000> : vector<8xf32>
    %4 = vector.multi_reduction <maximumf>, %0, %cst [1] : vector<8x32xf32> to vector<8xf32>
    %5 = vector.shape_cast %4 : vector<8xf32> to vector<8x1xf32>
    %6 = vector.broadcast %5 : vector<8x1xf32> to vector<8x32xf32>
    %7 = arith.subf %0, %6 : vector<8x32xf32>
    %8 = math.exp %7 : vector<8x32xf32>
    %cst_5 = arith.constant dense<0.000000e+00> : vector<8xf32>
    %9 = vector.multi_reduction <add>, %8, %cst_5 [1] : vector<8x32xf32> to vector<8xf32>
    %10 = vector.shape_cast %9 : vector<8xf32> to vector<8x1xf32>
    %11 = math.log %10 : vector<8x1xf32>
    %12 = vector.broadcast %3 : vector<8x1xi32> to vector<8x32xi32>
    %13 = arith.cmpi eq, %2, %12 : vector<8x32xi32>
    %14 = arith.extui %13 : vector<8x32xi1> to vector<8x32xi32>
    %15 = arith.sitofp %14 : vector<8x32xi32> to vector<8x32xf32>
    %16 = arith.mulf %15, %0 : vector<8x32xf32>
    %cst_6 = arith.constant dense<0.000000e+00> : vector<8xf32>
    %17 = vector.multi_reduction <add>, %16, %cst_6 [1] : vector<8x32xf32> to vector<8xf32>
    %18 = vector.shape_cast %17 : vector<8xf32> to vector<8x1xf32>
    %19 = arith.addf %5, %11 : vector<8x1xf32>
    %20 = arith.subf %19, %18 : vector<8x1xf32>
    %c0_7 = arith.constant 0 : index
    %c0_8 = arith.constant 0 : index
    %21 = vector.load %arg4[%c0_7, %c0_8] : memref<8x1xi32, #tpu.memory_space<vmem>>, vector<8x1xi32>
    %cst_9 = arith.constant dense<0xFF800000> : vector<8xf32>
    %22 = vector.multi_reduction <maximumf>, %1, %cst_9 [1] : vector<8x32xf32> to vector<8xf32>
    %23 = vector.shape_cast %22 : vector<8xf32> to vector<8x1xf32>
    %24 = vector.broadcast %23 : vector<8x1xf32> to vector<8x32xf32>
    %25 = arith.subf %1, %24 : vector<8x32xf32>
    %26 = math.exp %25 : vector<8x32xf32>
    %cst_10 = arith.constant dense<0.000000e+00> : vector<8xf32>
    %27 = vector.multi_reduction <add>, %26, %cst_10 [1] : vector<8x32xf32> to vector<8xf32>
    %28 = vector.shape_cast %27 : vector<8xf32> to vector<8x1xf32>
    %29 = math.log %28 : vector<8x1xf32>
    %30 = vector.broadcast %21 : vector<8x1xi32> to vector<8x32xi32>
    %31 = arith.cmpi eq, %2, %30 : vector<8x32xi32>
    %32 = arith.extui %31 : vector<8x32xi1> to vector<8x32xi32>
    %33 = arith.sitofp %32 : vector<8x32xi32> to vector<8x32xf32>
    %34 = arith.mulf %33, %1 : vector<8x32xf32>
    %cst_11 = arith.constant dense<0.000000e+00> : vector<8xf32>
    %35 = vector.multi_reduction <add>, %34, %cst_11 [1] : vector<8x32xf32> to vector<8xf32>
    %36 = vector.shape_cast %35 : vector<8xf32> to vector<8x1xf32>
    %37 = arith.addf %23, %29 : vector<8x1xf32>
    %38 = arith.subf %37, %36 : vector<8x1xf32>
    %39 = arith.addf %20, %38 : vector<8x1xf32>
    %c0_12 = arith.constant 0 : index
    %c0_13 = arith.constant 0 : index
    %40 = vector.load %arg5[%c0_12, %c0_13] : memref<8x1xf32, #tpu.memory_space<vmem>>, vector<8x1xf32>
    tpu.vector_store %arg5[%c0_12, %c0_13], %39 {strides = array<i32>} : memref<8x1xf32, #tpu.memory_space<vmem>>, vector<8x1xf32>,
    return
  }
  func.func @transform_0(%arg0: i32) -> (i32, i32) {
    %c0_i32 = arith.constant 0 : i32
    %c0_i32_0 = arith.constant 0 : i32
    return %arg0, %c0_i32 : i32, i32
  }
  func.func @transform_1(%arg0: i32) -> (i32, i32) {
    %c0_i32 = arith.constant 0 : i32
    %c0_i32_0 = arith.constant 0 : i32
    return %arg0, %c0_i32 : i32, i32
  }
  func.func @transform_2(%arg0: i32) -> (i32, i32) {
    %c0_i32 = arith.constant 0 : i32
    %c0_i32_0 = arith.constant 0 : i32
    return %arg0, %c0_i32 : i32, i32
  }
  func.func @transform_3(%arg0: i32) -> (i32, i32) {
    %c0_i32 = arith.constant 0 : i32
    %c0_i32_0 = arith.constant 0 : i32
    return %arg0, %c0_i32 : i32, i32
  }
  func.func @transform_4(%arg0: i32) -> (i32, i32) {
    %c0_i32 = arith.constant 0 : i32
    %c0_i32_0 = arith.constant 0 : i32
    return %arg0, %c0_i32 : i32, i32
  }
}

</mosaic_0001>

<bundles_post_ra>
// kernel: tpu_custom_call.1
= control target key start
LH: loop header
LB: loop body
LE: loop exit
PB: predicated region body
PF: predicated region fallthrough
CT: control target
= control target key end

     0   :  { %vm22_vm0 = vcmask 261120   ;;  %v91_v2 = vmov 0   ;;  %v19_v8 = vlaneseq  ;;  %v92_v17 = vmov 0.0   ;;  %s139_s0 = inlined_call_operand.vmem [shape: f32[8,32], index: 0, kind: input, shape index: {}]   ;;  %s140_s1 = inlined_call_operand.vmem [shape: f32[8,32], index: 1, kind: input, shape index: {}]   ;;  %s141_s2 = inlined_call_operand.vmem [shape: s32[8,1], index: 2, kind: input, shape index: {}]   ;;  %s142_s3 = inlined_call_operand.vmem [shape: s32[8,1], index: 3, kind: input, shape index: {}]   ;;  %s143_s4 = inlined_call_operand.vmem [shape: f32[8,1], index: 4, kind: output, shape index: {}]  }
   0x1   :  { %v17_v0 = vld [vmem:[%s139_s0] sm:$0xff]  ;;  %81 = vset.pattern.permute.xlu1 %v91_v2  ;;  %82 = vset.pattern.permute.xlu0 %v91_v2  ;;  %vm71_vm3 = vcmask 7168  }
   0x2   :  { %v18_v1 = vld [vmem:[%s140_s1] sm:$0xff]  ;;  %v23_v4 = vsel %vm22_vm0, %v17_v0, -inf  ;;  %v20_v13 = vand.u32 127, %v19_v8 }
   0x3   :  { %v21_v3 = vld [vmem:[%s141_s2] sm:$0xff]  ;;  %24 = vmax.xlane.f32.xlu0 %v23_v4  ;;  %v47_v6 = vsel %vm22_vm0, %v18_v1, -inf }
   0x4   :  { %35 = vperm.xlu1 %81, %v21_v3   ;;  %v46_v5 = vld [vmem:[%s142_s3] sm:$0xff] }
   0x7   :  { %48 = vmax.xlane.f32.xlu0 %v47_v6 }
   0x8   :  { %59 = vperm.xlu1 %81, %v46_v5  }
  0x83   :  { %v36_v11 = vpop.permute.xlu1 %35 }
  0x84   :  { %vm37_vm1 = vcmp.eq.s32.totalorder %v20_v13, %v36_v11 }
  0x85   :  { %v77_v18 = vsel %vm37_vm1, 1.0, %v92_v17 }
  0x86   :  { %v40_v19 = vmul.f32 %v77_v18, %v17_v0 }
  0x87   :  { %v60_v16 = vpop.permute.xlu1 %59 }
  0x88   :  { %vm61_vm2 = vcmp.eq.s32.totalorder %v20_v13, %v60_v16  ;;  %v41_v23 = vsel %vm22_vm0, %v40_v19, 0.0 }
  0x89   :  { %v78_v21 = vsel %vm61_vm2, 1.0, %v92_v17 }
  0x8a   :  { %v64_v24 = vmul.f32 %v78_v21, %v18_v1 }
  0x8c   :  { %v65_v27 = vsel %vm22_vm0, %v64_v24, 0.0 }
  0x90   :  { %v25_v7 = vpop.xlane.xlu0 %24 }
  0x91   :  { %v26_v9 = vsub.f32 %v17_v0, %v25_v7 }
  0x93   :  { %v27_v10 = vmul.f32 1.442695, %v26_v9 }
  0x94   :  { %v49_v12 = vpop.xlane.xlu0 %48 }
  0x95   :  { %83 = vpow2.f32 %v27_v10  ;;  %v50_v14 = vsub.f32 %v18_v1, %v49_v12 }
  0x97   :  { %v51_v15 = vmul.f32 1.442695, %v50_v14 }
  0x99   :  { %85 = vpow2.f32 %v51_v15 }
  0x9f   :  { %v84_v20 = vpop.eup %83 }
  0xa0   :  { %v29_v22 = vsel %vm22_vm0, %v84_v20, 0.0 }
  0xa1   :  { %30 = vadd.xlane.f32.xlu0 %v29_v22 }
  0xa3   :  { %v86_v25 = vpop.eup %85 }
  0xa4   :  { %v53_v26 = vsel %vm22_vm0, %v86_v25, 0.0 }
  0xa5   :  { %54 = vadd.xlane.f32.xlu1 %v53_v26  ;;  %42 = vadd.xlane.f32.xlu0 %v41_v23 }
  0xa9   :  { %66 = vadd.xlane.f32.xlu0 %v65_v27 }
 0x12e   :  { %v31_v28 = vpop.xlane.xlu0 %30 }
 0x12f   :  { %87 = vlog2.f32 %v31_v28 }
 0x132   :  { %v55_v29 = vpop.xlane.xlu1 %54  ;;  %v43_v32 = vpop.xlane.xlu0 %42 }
 0x133   :  { %89 = vlog2.f32 %v55_v29 }
 0x136   :  { %v67_v37 = vpop.xlane.xlu0 %66 }
 0x139   :  { %v88_v30 = vpop.eup %87 }
 0x13a   :  { %v33_v31 = vmul.f32 0.6931472, %v88_v30 }
 0x13c   :  { %v44_v35 = vadd.f32 %v33_v31, %v25_v7 }
 0x13d   :  { %v90_v33 = vpop.eup %89 }
 0x13e   :  { %v57_v34 = vmul.f32 0.6931472, %v90_v33  ;;  %v45_v38 = vsub.f32 %v44_v35, %v43_v32 }
 0x140   :  { %v68_v36 = vadd.f32 %v57_v34, %v49_v12 }
 0x142   :  { %v69_v39 = vsub.f32 %v68_v36, %v67_v37 }
 0x144   :  { %v70_v40 = vadd.f32 %v69_v39, %v45_v38 }
 0x146   :  { %72 = vst.msk [vmem:[%s143_s4] sm:$0xff] %vm71_vm3, %v70_v40 }

</bundles_post_ra>
